<compile_context>
chip_gen: v7x
topology: tpu7x:2x2x1
jax: 0.10.0
libtpu: 0.0.40
codegen_flags: <defaults>
</compile_context>

<pallas_src>
import functools

import jax
import jax.numpy as jnp
from jax import lax
from jax.experimental import pallas as pl
from jax.experimental.pallas import tpu as pltpu


def _round_up(x, m):
    return ((x + m - 1) // m) * m


def _cdiv(a, b):
    return (a + b - 1) // b


def _mlp_kernel(x_ref, w1_ref, b1_ref, w2_ref, b2_ref, o_ref, *, chunk, n_full, rem):
    # x_ref : (TILE_B, n_comp) f32  -- natural batch-major layout (single HBM read)
    # w1_ref: (hidden, n_comp) f32  -- PyTorch (out_features, in_features) layout
    # b1_ref: (hidden, 1)      f32
    # w2_ref: (hidden, 1)      f32
    # b2_ref: (1, 1)           f32 in SMEM
    # o_ref : (1, TILE_B)      f32  -- lane-dense output block (batch on lanes)
    w1 = w1_ref[...]
    b1 = b1_ref[...]
    w2 = w2_ref[...]
    b2 = b2_ref[0, 0]

    def process(off, size):
        xc = x_ref[pl.ds(off, size), :]                       # (size, n_comp) f32
        # Contract on n_comp -> lane-dense (hidden, size), f32 MXU accumulate.
        h = lax.dot_general(w1, xc, (((1,), (1,)), ((), ())),
                            preferred_element_type=jnp.float32)
        h = jnp.maximum(h + b1, 0.0)                          # bias + ReLU (VPU)
        # Dropout (eval mode) == identity.
        # 64 -> 1 projection: VPU multiply + XLU sublane reduce (no N=1 MXU matmul).
        logit = jnp.sum(h * w2, axis=0, keepdims=True) + b2   # (1, size)
        o_ref[:, pl.ds(off, size)] = jax.nn.sigmoid(logit)    # EUP exp + recip

    # Lane-chunk loop: caps the f32 hidden at hidden*chunk*4 bytes regardless of
    # TILE_B, so the DMA tile can be large without blowing VMEM (v7x: 64 MiB).
    @pl.loop(0, n_full)
    def _(c):
        process(pl.multiple_of(c * chunk, chunk), chunk)

    if rem > 0:
        process(n_full * chunk, rem)


def mlp_forward(signal, w1, b1, w2, b2, *,
                target_tile_bytes=4 * 1024 * 1024,
                max_tile_b=64 * 1024,
                chunk_lanes=2048):
    """signal: (B, ...) -> prob (B, 1) float32.

    Parameter layout matches PyTorch: w1 (64, n_components), b1 (64,),
    w2 (64,), b2 scalar. Exact f32 forward (eval-mode dropout == identity).
    """
    B = signal.shape[0]
    x = signal.reshape(B, -1).astype(jnp.float32)   # Flatten; no transpose/cast pass
    n_comp = x.shape[1]
    hidden = w1.shape[0]

    # --- Tile sizing ------------------------------------------------------
    # Target ~4 MiB of x per grid step (amortizes ~0.35 us/step overhead,
    # matters most on v7x's ~3.2 TB/s HBM); absolute lane cap keeps VMEM
    # bounded. Balanced tiles minimize tail padding.
    bytes_per_row = n_comp * 4
    tile_cap = max(128, min(max_tile_b, target_tile_bytes // bytes_per_row))
    n_tiles = max(1, _cdiv(B, tile_cap))
    if B > 128:
        # >= 2 near-equal tiles so ("parallel",) can use both v7x TensorCores;
        # even count for balance (harmless extra serial step on v5e/v6e).
        n_tiles = max(2, n_tiles)
        if n_tiles % 2:
            n_tiles += 1
    tile_b = _round_up(_cdiv(B, n_tiles), 128)
    b_pad = tile_b * n_tiles

    chunk = min(chunk_lanes, tile_b)     # in-kernel lane chunk (static)
    n_full = tile_b // chunk
    rem = tile_b - n_full * chunk        # static, multiple of 128

    if b_pad != B:
        # Only extra HBM pass left; taken only when B isn't already aligned,
        # and balanced tiles keep the padded rows small.
        x = jnp.pad(x, ((0, b_pad - B), (0, 0)))

    w1k = w1.astype(jnp.float32)                          # (hidden, n_comp)
    b1k = b1.reshape(hidden, 1).astype(jnp.float32)
    w2k = w2.reshape(hidden, 1).astype(jnp.float32)
    b2k = jnp.asarray(b2, jnp.float32).reshape(1, 1)

    cost = pl.CostEstimate(
        flops=2 * b_pad * n_comp * hidden + 4 * b_pad * hidden,
        transcendentals=2 * b_pad,                        # sigmoid ~ exp + reciprocal
        bytes_accessed=(b_pad * n_comp * 4                # x (f32, single read)
                        + hidden * n_comp * 4             # w1
                        + hidden * 4 * 2 + 4              # b1, w2, b2
                        + b_pad * 4),                     # output
    )

    kernel = functools.partial(_mlp_kernel, chunk=chunk, n_full=n_full, rem=rem)

    out = pl.pallas_call(
        kernel,
        out_shape=jax.ShapeDtypeStruct((1, b_pad), jnp.float32),
        grid=(n_tiles,),
        in_specs=[
            pl.BlockSpec((tile_b, n_comp), lambda i: (i, 0)),    # x: streamed per tile
            pl.BlockSpec((hidden, n_comp), lambda i: (0, 0)),    # W1: resident
            pl.BlockSpec((hidden, 1), lambda i: (0, 0)),         # b1: resident
            pl.BlockSpec((hidden, 1), lambda i: (0, 0)),         # w2: resident
            pl.BlockSpec(memory_space=pltpu.MemorySpace.SMEM),   # b2: SMEM scalar
        ],
        out_specs=pl.BlockSpec((1, tile_b), lambda i: (0, i)),   # lane-dense output
        compiler_params=pltpu.CompilerParams(
            dimension_semantics=("parallel",),
            vmem_limit_bytes=48 * 1024 * 1024,
        ),
        cost_estimate=cost,
    )(x, w1k, b1k, w2k, b2k)

    return out[0, :B].reshape(B, 1)


def init_params(key, n_components, hidden=64):
    """Deterministic init mimicking nn.Linear's uniform(-1/sqrt(fan_in), ...)."""
    k1, k2, k3, k4 = jax.random.split(key, 4)
    bound1 = 1.0 / jnp.sqrt(n_components)
    bound2 = 1.0 / jnp.sqrt(hidden)
    # PyTorch layout: weight (out_features, in_features).
    w1 = jax.random.uniform(k1, (hidden, n_components), jnp.float32, -bound1, bound1)
    b1 = jax.random.uniform(k2, (hidden,), jnp.float32, -bound1, bound1)
    w2 = jax.random.uniform(k3, (hidden,), jnp.float32, -bound2, bound2)
    b2 = jax.random.uniform(k4, (), jnp.float32, -bound2, bound2)
    return w1, b1, w2, b2


if __name__ == "__main__":
    key = jax.random.PRNGKey(0)
    batch, c, s = 2, 4, 8                 # nn.Flatten -> n_components = 32
    n_components = c * s

    k_x, k_p = jax.random.split(key)
    signal = jax.random.normal(k_x, (batch, c, s), jnp.float32)
    w1, b1, w2, b2 = init_params(k_p, n_components)

    prob = mlp_forward(signal, w1, b1, w2, b2)
    jax.block_until_ready(prob)

    # Pure-JAX f32 reference (eval-mode dropout == identity). Tolerance covers
    # possible MXU f32 precision-mode differences vs XLA's default dot path.
    x = signal.reshape(batch, -1)
    h_ref = jnp.maximum(
        jnp.dot(x, w1.T, preferred_element_type=jnp.float32) + b1[None, :], 0.0)
    ref = jax.nn.sigmoid(
        jnp.dot(h_ref, w2.reshape(-1, 1), preferred_element_type=jnp.float32) + b2)

    assert prob.shape == (batch, 1), prob.shape
    assert jnp.allclose(prob, ref, atol=2e-3, rtol=2e-3), (prob, ref)

    print("KERNEL_OK")
</pallas_src>

<mosaic_0001>
module attributes {stable_mosaic.version = 11 : i64} {
  func.func @_mlp_kernel(%arg0: i32, %arg1: memref<128x32xf32, #tpu.memory_space<vmem>>, %arg2: memref<64x32xf32, #tpu.memory_space<vmem>>, %arg3: memref<64x1xf32, #tpu.memory_space<vmem>>, %arg4: memref<64x1xf32, #tpu.memory_space<vmem>>, %arg5: memref<1x1xf32, #tpu.memory_space<smem>>, %arg6: memref<1x128xf32, #tpu.memory_space<vmem>>) attributes {dimension_semantics = [#tpu.dimension_semantics<parallel>], iteration_bounds = array<i64: 1>, scalar_prefetch = 0 : i64, scratch_operands = 0 : i64, tpu.core_type = #tpu.core_type<tc>, window_params = [{transform_indices = @transform_0, window_bounds = array<i64: 128, 32>}, {pipeline_mode = #tpu.pipeline_mode<synchronous>, transform_indices = @transform_1, window_bounds = array<i64: 64, 32>}, {pipeline_mode = #tpu.pipeline_mode<synchronous>, transform_indices = @transform_2, window_bounds = array<i64: 64, 1>}, {pipeline_mode = #tpu.pipeline_mode<synchronous>, transform_indices = @transform_3, window_bounds = array<i64: 64, 1>}, {transform_indices = @transform_4, window_bounds = array<i64: 1, 1>}, {transform_indices = @transform_5, window_bounds = array<i64: 1, 128>}]} {
    %c0 = arith.constant 0 : index
    %c0_0 = arith.constant 0 : index
    %0 = vector.load %arg2[%c0, %c0_0] : memref<64x32xf32, #tpu.memory_space<vmem>>, vector<64x32xf32>
    %c0_1 = arith.constant 0 : index
    %c0_2 = arith.constant 0 : index
    %1 = vector.load %arg3[%c0_1, %c0_2] : memref<64x1xf32, #tpu.memory_space<vmem>>, vector<64x1xf32>
    %c0_3 = arith.constant 0 : index
    %c0_4 = arith.constant 0 : index
    %2 = vector.load %arg4[%c0_3, %c0_4] : memref<64x1xf32, #tpu.memory_space<vmem>>, vector<64x1xf32>
    %c0_5 = arith.constant 0 : index
    %c0_6 = arith.constant 0 : index
    %3 = memref.load %arg5[%c0_5, %c0_6] : memref<1x1xf32, #tpu.memory_space<smem>>
    %c0_i32 = arith.constant 0 : i32
    %c1_i32 = arith.constant 1 : i32
    %4 = arith.muli %c0_i32, %c1_i32 : i32
    %c0_i32_7 = arith.constant 0 : i32
    %5 = arith.addi %c0_i32_7, %4 : i32
    %c128_i32 = arith.constant 128 : i32
    %6 = arith.muli %5, %c128_i32 : i32
    %7 = tpu.assume_multiple %6, 128 : i32
    %8 = arith.index_cast %7 : i32 to index
    %c0_8 = arith.constant 0 : index
    %9 = vector.load %arg1[%8, %c0_8] : memref<128x32xf32, #tpu.memory_space<vmem>>, vector<128x32xf32>
    %cst = arith.constant dense<0.000000e+00> : vector<64x128xf32>
    %10 = tpu.matmul %0, %9, %cst {dimension_numbers = #tpu.dot_dimension_numbers<[1], [1], [0], [0], [0, 0, 1, 0], [], []>} : vector<64x32xf32>, vector<128x32xf32>, vector<64x128xf32> -> vector<64x128xf32>
    %11 = vector.broadcast %1 : vector<64x1xf32> to vector<64x128xf32>
    %12 = arith.addf %10, %11 : vector<64x128xf32>
    %cst_9 = arith.constant 0.000000e+00 : f32
    %13 = vector.broadcast %cst_9 : f32 to vector<64x128xf32>
    %14 = arith.maximumf %12, %13 : vector<64x128xf32>
    %15 = vector.broadcast %2 : vector<64x1xf32> to vector<64x128xf32>
    %16 = arith.mulf %14, %15 : vector<64x128xf32>
    %cst_10 = arith.constant dense<0.000000e+00> : vector<128xf32>
    %17 = vector.multi_reduction <add>, %16, %cst_10 [0] : vector<64x128xf32> to vector<128xf32>
    %18 = vector.shape_cast %17 : vector<128xf32> to vector<1x128xf32>
    %19 = vector.broadcast %3 : f32 to vector<1x128xf32>
    %20 = arith.addf %18, %19 : vector<1x128xf32>
    %21 = arith.negf %20 : vector<1x128xf32>
    %22 = math.exp %21 : vector<1x128xf32>
    %cst_11 = arith.constant 1.000000e+00 : f32
    %23 = vector.broadcast %cst_11 : f32 to vector<1x128xf32>
    %24 = arith.addf %23, %22 : vector<1x128xf32>
    %25 = arith.divf %23, %24 : vector<1x128xf32>
    %c0_12 = arith.constant 0 : index
    %26 = arith.index_cast %7 : i32 to index
    %27 = vector.load %arg6[%c0_12, %26] : memref<1x128xf32, #tpu.memory_space<vmem>>, vector<1x128xf32>
    tpu.vector_store %arg6[%c0_12, %26], %25 {strides = array<i32>} : memref<1x128xf32, #tpu.memory_space<vmem>>, vector<1x128xf32>,
    %c1_i32_13 = arith.constant 1 : i32
    return
  }
  func.func @transform_0(%arg0: i32) -> (i32, i32) {
    %c0_i32 = arith.constant 0 : i32
    %c0_i32_0 = arith.constant 0 : i32
    return %arg0, %c0_i32 : i32, i32
  }
  func.func @transform_1(%arg0: i32) -> (i32, i32) {
    %c0_i32 = arith.constant 0 : i32
    %c0_i32_0 = arith.constant 0 : i32
    %c0_i32_1 = arith.constant 0 : i32
    return %c0_i32, %c0_i32_0 : i32, i32
  }
  func.func @transform_2(%arg0: i32) -> (i32, i32) {
    %c0_i32 = arith.constant 0 : i32
    %c0_i32_0 = arith.constant 0 : i32
    %c0_i32_1 = arith.constant 0 : i32
    return %c0_i32, %c0_i32_0 : i32, i32
  }
  func.func @transform_3(%arg0: i32) -> (i32, i32) {
    %c0_i32 = arith.constant 0 : i32
    %c0_i32_0 = arith.constant 0 : i32
    %c0_i32_1 = arith.constant 0 : i32
    return %c0_i32, %c0_i32_0 : i32, i32
  }
  func.func @transform_4(%arg0: i32) -> (i32, i32) {
    %c0_i32 = arith.constant 0 : i32
    %c0_i32_0 = arith.constant 0 : i32
    %c0_i32_1 = arith.constant 0 : i32
    return %c0_i32, %c0_i32_0 : i32, i32
  }
  func.func @transform_5(%arg0: i32) -> (i32, i32) {
    %c0_i32 = arith.constant 0 : i32
    %c0_i32_0 = arith.constant 0 : i32
    return %c0_i32, %arg0 : i32, i32
  }
}

</mosaic_0001>

<bundles_post_ra>
// kernel: tpu_custom_call.1
= control target key start
LH: loop header
LB: loop body
LE: loop exit
PB: predicated region body
PF: predicated region fallthrough
CT: control target
= control target key end

     0   :  { %vm103_vm0 = vcmask 261120   ;;  %v562_v6 = vmov 0   ;;  %s807_s0 = inlined_call_operand.vmem [shape: f32[128,32], index: 0, kind: input, shape index: {}]   ;;  %s808_s1 = inlined_call_operand.vmem [shape: f32[64,32], index: 1, kind: input, shape index: {}]   ;;  %s809_s2 = inlined_call_operand.vmem [shape: f32[64,1], index: 2, kind: input, shape index: {}]   ;;  %s810_s3 = inlined_call_operand.vmem [shape: f32[64,1], index: 3, kind: input, shape index: {}]   ;;  %s811_s4 = inlined_call_operand.<no memory space> [shape: f32[1,1], index: 4, kind: input, shape index: {}]   ;;  %s812_s5 = inlined_call_operand.hbm [shape: f32[1,128], index: 5, kind: output, shape index: {}]  }
   0x1   :  { %v47_v0 = vld [vmem:[%s807_s0] sm:$0xff]  ;;  %v48_v1 = vld [vmem:[%s807_s0 + $0x8] sm:$0xff]  ;;  %v49_v2 = vld [vmem:[%s807_s0 + $0x10] sm:$0xff]  ;;  %532 = vset.pattern.permute.xlu0 %v562_v6  ;;  %533 = vset.pattern.permute.xlu1 %v562_v6 }
   0x2   :  { %v466_v3 = vpack.c.bf16 %v48_v1, %v47_v0  ;;  %vm605_vm1 = vmpackc.low %vm103_vm0, %vm103_vm0  ;;  %v50_v5 = vld [vmem:[%s807_s0 + $0x18] sm:$0xff]  ;;  %v22_v8 = vld [vmem:[%s808_s1] sm:$0xff] }
   0x3   :  { %v472_v7 = vpack.c.bf16 %v50_v5, %v49_v2  ;;  %v51_v9 = vld [vmem:[%s807_s0 + $0x20] sm:$0xff]  ;;  %v52_v10 = vld [vmem:[%s807_s0 + $0x28] sm:$0xff]  ;;  %454 = vmatprep.mubr.msk.f32.mxu0 %vm103_vm0, %v22_v8  ;;  %v32_v13 = vld [vmem:[%s809_s2 + $0x10] sm:$0xff] }
   0x4   :  { %468 = vmatprep.subr.msk.bf16.mxu0 %vm605_vm1, %v466_v3  ;;  %514 = vmatprep.subr.msk.bf16.mxu1 %vm605_vm1, %v466_v3  ;;  %v26_v11 = vld [vmem:[%s808_s1 + $0x20] sm:$0xff]  ;;  %v478_v14 = vpack.c.bf16 %v52_v10, %v51_v9  ;;  %v31_v15 = vld [vmem:[%s809_s2 + $0x8] sm:$0xff]  ;;  %v33_v16 = vld [vmem:[%s809_s2 + $0x18] sm:$0xff] }
   0x5   :  { %471 = vmatpush3.bf16.xpose.msk.msra.mxu0 %vm605_vm1, %v466_v3  ;;  %522 = vmatpush3.bf16.xpose.msk.msra.mxu1 %vm605_vm1, %v466_v3  ;;  %v30_v12 = vld [vmem:[%s809_s2] sm:$0xff] }
   0x6   :  { %474 = vmatprep.subr.msk.bf16.mxu0 %vm605_vm1, %v472_v7  ;;  %515 = vmatprep.subr.msk.bf16.mxu1 %vm605_vm1, %v472_v7 }
   0x7   :  { %460 = vmatprep.mubr.msk.f32.mxu1 %vm103_vm0, %v26_v11  ;;  %65 = vperm.xlu0 %532, %v30_v12  }
   0x8   :  { %75 = vperm.xlu1 %533, %v32_v13  }
   0xd   :  { %477 = vmatpush3.bf16.xpose.msk.msra.mxu0 %vm605_vm1, %v472_v7  ;;  %523 = vmatpush3.bf16.xpose.msk.msra.mxu1 %vm605_vm1, %v472_v7 }
   0xe   :  { %480 = vmatprep.subr.msk.bf16.mxu0 %vm605_vm1, %v478_v14  ;;  %516 = vmatprep.subr.msk.bf16.mxu1 %vm605_vm1, %v478_v14 }
   0xf   :  { %11 = vsyncpa [#allocation4], 0  ;;  %v53_v17 = vld [vmem:[%s807_s0 + $0x30] sm:$0xff]  ;;  %v54_v18 = vld [vmem:[%s807_s0 + $0x38] sm:$0xff]  ;;  %70 = vperm.xlu0 %532, %v31_v15   ;;  %80 = vperm.xlu1 %533, %v33_v16   ;;  %s563_s21 = smov [#allocation3]  }
  0x10   :  { %v38_v19 = vld [vmem:[%s810_s3] sm:$0xff]  ;;  %v39_v20 = vld [vmem:[%s810_s3 + $0x8] sm:$0xff]  ;;  %v484_v21 = vpack.c.bf16 %v54_v18, %v53_v17  ;;  %v40_v23 = vld [vmem:[%s810_s3 + $0x10] sm:$0xff]  ;;  %s365_s22 = sshll.u32 %s563_s21, 4  ;;  %s366_s22 = int_to_ptr.vmem [resolvable:$true] %s365_s22 }
  0x11   :  { %v34_v22 = vld [vmem:[%s809_s2 + $0x20] sm:$0xff]  ;;  %v56_v25 = vld [vmem:[%s807_s0 + $0x48] sm:$0xff]  ;;  %v41_v27 = vld [vmem:[%s810_s3 + $0x18] sm:$0xff]  ;;  %s538_s23 = scalar_lea.vmem %s366_s22, 16  ;;  %s542_s24 = scalar_lea.vmem %s366_s22, 32 }
  0x12   :  { %v55_v24 = vld [vmem:[%s807_s0 + $0x40] sm:$0xff]  ;;  %v35_v26 = vld [vmem:[%s809_s2 + $0x28] sm:$0xff]  ;;  %v36_v29 = vld [vmem:[%s809_s2 + $0x30] sm:$0xff]  ;;  %p539_p0 = scmp.ne.s32.totalorder %s366_s22, %s538_s23  ;;  %p543_p1 = scmp.lt.s32.totalorder %s366_s22, %s366_s22 }
  0x13   :  { %291 = vperm.xlu0 %532, %v38_v19   ;;  %296 = vperm.xlu1 %533, %v39_v20   ;;  %v490_v28 = vpack.c.bf16 %v56_v25, %v55_v24  ;;  %v42_v30 = vld [vmem:[%s810_s3 + $0x20] sm:$0xff]  ;;  %v57_v31 = vld [vmem:[%s807_s0 + $0x50] sm:$0xff]  ;;  %v58_v32 = vld [vmem:[%s807_s0 + $0x58] sm:$0xff]  ;;  %p544_p2 = scmp.lt.s32.totalorder %s542_s24, %s538_s23 }
  0x14   :  { %v37_v33 = vld [vmem:[%s809_s2 + $0x38] sm:$0xff]  ;;  %v43_v34 = vld [vmem:[%s810_s3 + $0x28] sm:$0xff]  ;;  %v496_v35 = vpack.c.bf16 %v58_v32, %v57_v31  ;;  %v44_v36 = vld [vmem:[%s810_s3 + $0x30] sm:$0xff] }
  0x15   :  { %483 = vmatpush3.bf16.xpose.msk.msra.mxu0 %vm605_vm1, %v478_v14  ;;  %524 = vmatpush3.bf16.xpose.msk.msra.mxu1 %vm605_vm1, %v478_v14  ;;  %v45_v37 = vld [vmem:[%s810_s3 + $0x38] sm:$0xff]  ;;  %v59_v38 = vld [vmem:[%s807_s0 + $0x60] sm:$0xff]  ;;  %v60_v39 = vld [vmem:[%s807_s0 + $0x68] sm:$0xff]  ;;  %p545_p3 = por %p544_p2, %p543_p1 }
  0x16   :  { %486 = vmatprep.subr.msk.bf16.mxu0 %vm605_vm1, %v484_v21  ;;  %517 = vmatprep.subr.msk.bf16.mxu1 %vm605_vm1, %v484_v21  ;;  %v502_v40 = vpack.c.bf16 %v60_v39, %v59_v38  ;;  %v61_v41 = vld [vmem:[%s807_s0 + $0x70] sm:$0xff]  ;;  %v62_v42 = vld [vmem:[%s807_s0 + $0x78] sm:$0xff]  ;;  %v23_v44 = vld [vmem:[%s808_s1 + $0x8] sm:$0xff] }
  0x17   :  { %85 = vperm.xlu0 %532, %v34_v22   ;;  %301 = vperm.xlu1 %533, %v40_v23   ;;  %v508_v43 = vpack.c.bf16 %v62_v42, %v61_v41  ;;  %v27_v45 = vld [vmem:[%s808_s1 + $0x28] sm:$0xff]  ;;  %v24_v46 = vld [vmem:[%s808_s1 + $0x10] sm:$0xff]  ;;  %v25_v48 = vld [vmem:[%s808_s1 + $0x18] sm:$0xff]  ;;  %p546_p4 = pnand %p545_p3, %p539_p0 }
  0x18   :  { %v28_v47 = vld [vmem:[%s808_s1 + $0x30] sm:$0xff]  ;;  %v29_v49 = vld [vmem:[%s808_s1 + $0x38] sm:$0xff] }
  0x1b   :  { %90 = vperm.xlu0 %532, %v35_v26   ;;  %306 = vperm.xlu1 %533, %v41_v27  }
  0x1d   :  { %489 = vmatpush3.bf16.xpose.msk.msra.mxu0 %vm605_vm1, %v484_v21  ;;  %525 = vmatpush3.bf16.xpose.msk.msra.mxu1 %vm605_vm1, %v484_v21 }
  0x1e   :  { %492 = vmatprep.subr.msk.bf16.mxu0 %vm605_vm1, %v490_v28  ;;  %518 = vmatprep.subr.msk.bf16.mxu1 %vm605_vm1, %v490_v28 }
  0x1f   :  { %95 = vperm.xlu0 %532, %v36_v29   ;;  %311 = vperm.xlu1 %533, %v42_v30  }
  0x23   :  { %100 = vperm.xlu0 %532, %v37_v33   ;;  %316 = vperm.xlu1 %533, %v43_v34  }
  0x25   :  { %495 = vmatpush3.bf16.xpose.msk.msra.mxu0 %vm605_vm1, %v490_v28  ;;  %526 = vmatpush3.bf16.xpose.msk.msra.mxu1 %vm605_vm1, %v490_v28 }
  0x26   :  { %498 = vmatprep.subr.msk.bf16.mxu0 %vm605_vm1, %v496_v35  ;;  %519 = vmatprep.subr.msk.bf16.mxu1 %vm605_vm1, %v496_v35 }
  0x27   :  { %321 = vperm.xlu0 %532, %v44_v36   ;;  %326 = vperm.xlu1 %533, %v45_v37  }
  0x2d   :  { %501 = vmatpush3.bf16.xpose.msk.msra.mxu0 %vm605_vm1, %v496_v35  ;;  %527 = vmatpush3.bf16.xpose.msk.msra.mxu1 %vm605_vm1, %v496_v35 }
  0x2e   :  { %504 = vmatprep.subr.msk.bf16.mxu0 %vm605_vm1, %v502_v40  ;;  %520 = vmatprep.subr.msk.bf16.mxu1 %vm605_vm1, %v502_v40 }
  0x35   :  { %507 = vmatpush3.bf16.xpose.msk.msra.mxu0 %vm605_vm1, %v502_v40  ;;  %528 = vmatpush3.bf16.xpose.msk.msra.mxu1 %vm605_vm1, %v502_v40 }
  0x36   :  { %510 = vmatprep.subr.msk.bf16.mxu0 %vm605_vm1, %v508_v43  ;;  %521 = vmatprep.subr.msk.bf16.mxu1 %vm605_vm1, %v508_v43 }
  0x3d   :  { %513 = vmatpush3.bf16.xpose.msk.msra.mxu0 %vm605_vm1, %v508_v43  ;;  %529 = vmatpush3.bf16.xpose.msk.msra.mxu1 %vm605_vm1, %v508_v43 }
  0x44   :  { %455 = vmatmul.mubr.msk.f32.vlgmr.msra.gmra.mrb[0].mxu0 %vm103_vm0, %v23_v44  ;;  %461 = vmatmul.mubr.msk.f32.vlgmr.msra.gmra.mrb[0].mxu1 %vm103_vm0, %v27_v45 }
  0x45   :  { %457 = vmatprep.mubr.msk.f32.mxu0 %vm103_vm0, %v24_v46  ;;  %463 = vmatprep.mubr.msk.f32.mxu1 %vm103_vm0, %v28_v47  ;;  %v350_v46 = vstv %s811_s4 }
  0x48   :  { %458 = vmatmul.mubr.msk.f32.gmra.mrb[2].mxu0 %vm103_vm0, %v25_v48  ;;  %464 = vmatmul.mubr.msk.f32.gmra.mrb[2].mxu1 %vm103_vm0, %v29_v49 }
  0x86   :  { %v66_v50 = vpop.permute.xlu0 %65 }
  0x87   :  { %v76_v51 = vpop.permute.xlu1 %75 }
  0x8e   :  { %v71_v52 = vpop.permute.xlu0 %70  ;;  %v81_v53 = vpop.permute.xlu1 %80 }
  0x92   :  { %v292_v54 = vpop.permute.xlu0 %291  ;;  %v297_v55 = vpop.permute.xlu1 %296 }
  0x96   :  { %v86_v56 = vpop.permute.xlu0 %85  ;;  %v302_v57 = vpop.permute.xlu1 %301 }
  0x9a   :  { %v91_v58 = vpop.permute.xlu0 %90  ;;  %v307_v59 = vpop.permute.xlu1 %306 }
  0x9e   :  { %v96_v2 = vpop.permute.xlu0 %95  ;;  %v312_v14 = vpop.permute.xlu1 %311 }
  0xa2   :  { %v101_v22 = vpop.permute.xlu0 %100  ;;  %v317_v27 = vpop.permute.xlu1 %316 }
  0xa6   :  { %v322_v34 = vpop.permute.xlu0 %321  ;;  %v327_v37 = vpop.permute.xlu1 %326 }
 0x117   :  { %v456_v60 = vpop.f32.mrb[0].mxu0  ;;  %v462_v61 = vpop.f32.mrb[0].mxu1 }
 0x118   :  { %v248_v62 = vadd.f32 %v456_v60, %v71_v52  ;;  %v242_v63 = vpop.f32.mrb[1].mxu0  ;;  %v262_v0 = vpop.f32.mrb[1].mxu1  ;;  %v268_v15 = vadd.f32 %v462_v61, %v91_v58 }
 0x119   :  { %v243_v1 = vadd.f32 %v242_v63, %v66_v50  ;;  %v263_v12 = vadd.f32 %v262_v0, %v86_v56 }
 0x11a   :  { %v282_v3 = vmax.f32 %v248_v62, 0.0  ;;  %v286_v23 = vmax.f32 %v268_v15, 0.0 }
 0x11b   :  { %v281_v4 = vmax.f32 %v243_v1, 0.0  ;;  %v459_v5 = vpop.f32.mrb[2].mxu0  ;;  %v465_v6 = vpop.f32.mrb[2].mxu1  ;;  %v285_v19 = vmax.f32 %v263_v12, 0.0 }
 0x11c   :  { %v330_v7 = vmul.f32 %v297_v55, %v282_v3  ;;  %v258_v8 = vadd.f32 %v459_v5, %v81_v53  ;;  %v252_v9 = vpop.f32.mrb[3].mxu0  ;;  %v272_v10 = vpop.f32.mrb[3].mxu1  ;;  %v278_v25 = vadd.f32 %v465_v6, %v101_v22  ;;  %v334_v31 = vmul.f32 %v317_v27, %v286_v23 }
 0x11d   :  { %v329_v11 = vmul.f32 %v292_v54, %v281_v4  ;;  %v253_v13 = vadd.f32 %v252_v9, %v76_v51  ;;  %v273_v21 = vadd.f32 %v272_v10, %v96_v2  ;;  %v333_v28 = vmul.f32 %v312_v14, %v285_v19 }
 0x11e   :  { %v284_v17 = vmax.f32 %v258_v8, 0.0  ;;  %v288_v32 = vmax.f32 %v278_v25, 0.0 }
 0x11f   :  { %v337_v16 = vadd.f32 %v330_v7, %v329_v11  ;;  %v283_v18 = vmax.f32 %v253_v13, 0.0  ;;  %v287_v30 = vmax.f32 %v273_v21, 0.0 }
 0x120   :  { %v332_v24 = vmul.f32 %v307_v59, %v284_v17  ;;  %v336_v38 = vmul.f32 %v327_v37, %v288_v32 }
 0x121   :  { %v331_v20 = vmul.f32 %v302_v57, %v283_v18  ;;  %v335_v35 = vmul.f32 %v322_v34, %v287_v30 }
 0x123   :  { %v338_v26 = vadd.f32 %v337_v16, %v331_v20 }
 0x125   :  { %v339_v29 = vadd.f32 %v338_v26, %v332_v24 }
 0x127   :  { %v340_v33 = vadd.f32 %v339_v29, %v333_v28 }
 0x129   :  { %v341_v36 = vadd.f32 %v340_v33, %v334_v31 }
 0x12b   :  { %v342_v39 = vadd.f32 %v341_v36, %v335_v35 }
 0x12d   :  { %v343_v40 = vadd.f32 %v342_v39, %v336_v38 }
 0x12f   :  { %v344_v41 = vrot.slane %v343_v40, 4 }
 0x131   :  { %v345_v42 = vadd.f32 %v344_v41, %v343_v40 }
 0x133   :  { %v346_v43 = vrot.slane %v345_v42, 2 }
 0x135   :  { %v347_v44 = vadd.f32 %v346_v43, %v345_v42 }
 0x137   :  { %v348_v45 = vrot.slane %v347_v44, 1 }
 0x139   :  { %v349_v47 = vadd.f32 %v348_v45, %v347_v44 }
 0x13b   :  { %v351_v48 = vadd.f32 %v350_v46, %v349_v47 }
 0x13d   :  { %v397_v49 = vmul.f32 -1.442695, %v351_v48 }
 0x13f   :  { %534 = vpow2.f32 %v397_v49 }
 0x149   :  { %v535_v50 = vpop.eup %534 }
 0x14a   :  { %v355_v51 = vadd.f32 1.0, %v535_v50 }
 0x14c   :  { %536 = vrcp.f32 %v355_v51 }
 0x156   :  { %v537_v52 = vpop.eup %536 }
 0x157   :  { %358 = vst [vmem:[#allocation3] sm:$0x1] %v537_v52 }
 0x158   :  { %549 = shalt.err (!%p546_p4)
}
 0x159   :  { %s550_s26 = scalar_lea.hbm %s812_s5, 16 }
 0x15a   :  { %p551_p5 = scmp.ne.s32.totalorder %s812_s5, %s550_s26  ;;  %p554_p6 = scmp.lt.u32.totalorder %s550_s26, %s812_s5 }
 0x15c   :  { %p556_p7 = pnand %p554_p6, %p551_p5 }
 0x15e   :  { %559 = shalt.err (!%p556_p7)
}
 0x15f   :  { %368 = dma.vmem_to_hbm [thread:$0]  %s366_s22, 16, %s812_s5, [#allocation4]  }
 0x160   :  { %560 = dma.done.wait [#allocation4], 16  }
 0x161   :  { %561 = vsyncadd [#allocation4], 4294967280 }
 0x162   :  { %372 = vsyncpa [#allocation4], 1 }

</bundles_post_ra>
